<compile_context>
chip_gen: v7x
topology: tpu7x:2x2x1
jax: 0.10.0
libtpu: 0.0.40
codegen_flags: <defaults>
</compile_context>

<pallas_src>
from functools import partial

import jax
import jax.numpy as jnp
from jax.experimental import pallas as pl
from jax.experimental.pallas import tpu as pltpu


# ----------------------------------------------------------------------------
# Kernel: fused 3-layer MLP on one batch tile.
# x:(tb, D_pad) @ W1:(D_pad, H) -> ReLU -> @ W2:(H, H) -> ReLU -> @ W3:(H, A_pad)
# Matmul inputs may be bf16; accumulation, bias add and ReLU are f32.
# ----------------------------------------------------------------------------
def actor_kernel(x_ref, w1_ref, b1_ref, w2_ref, b2_ref, w3_ref, b3_ref, o_ref):
    h1 = jnp.dot(x_ref[...], w1_ref[...], preferred_element_type=jnp.float32)
    h1 = jnp.maximum(h1 + b1_ref[...], 0.0)

    h2 = jnp.dot(h1.astype(w2_ref.dtype), w2_ref[...],
                 preferred_element_type=jnp.float32)
    h2 = jnp.maximum(h2 + b2_ref[...], 0.0)

    out = jnp.dot(h2.astype(w3_ref.dtype), w3_ref[...],
                  preferred_element_type=jnp.float32) + b3_ref[...]
    o_ref[...] = out.astype(o_ref.dtype)


def _round_up(n, m):
    return ((n + m - 1) // m) * m


# ----------------------------------------------------------------------------
# One-time parameter preparation (hoisted out of the forward path).
# Zero-padding W1 rows / W3 columns / b3 lanes keeps the math exact; biases
# stay f32 so bias add + ReLU run in f32 regardless of the matmul dtype.
# ----------------------------------------------------------------------------
def prepare_params(params, *, use_bf16=True):
    w1, b1, w2, b2, w3, b3 = params
    D_in, H = w1.shape
    A = w3.shape[1]
    D_pad = _round_up(D_in, 128)
    A_pad = _round_up(A, 128)

    f32 = jnp.float32
    mm = jnp.bfloat16 if use_bf16 else f32

    w1_p = jnp.zeros((D_pad, H), mm).at[:D_in, :].set(w1.astype(mm))
    w2_p = w2.astype(mm)
    w3_p = jnp.zeros((H, A_pad), mm).at[:, :A].set(w3.astype(mm))
    b1_p = b1.reshape(1, H).astype(f32)
    b2_p = b2.reshape(1, H).astype(f32)
    b3_p = jnp.zeros((1, A_pad), f32).at[:, :A].set(b3.reshape(1, A).astype(f32))
    return (w1_p, b1_p, w2_p, b2_p, w3_p, b3_p)


# ----------------------------------------------------------------------------
# Forward: pad x once (in the matmul dtype), tile the batch, fused MLP kernel,
# slice the padded logits back.  Entirely under one jit.
# ----------------------------------------------------------------------------
@partial(jax.jit, static_argnames=("num_actions", "tb"))
def actor_net_forward(x, prepped, *, num_actions, tb=256):
    w1_p, b1_p, w2_p, b2_p, w3_p, b3_p = prepped
    B, D_in = x.shape
    D_pad, H = w1_p.shape
    A_pad = w3_p.shape[1]
    mm_dtype = w1_p.dtype

    # Batch tiling: tiny batches collapse to one grid step; larger batches get
    # at least 2 grid steps (v7x megacore split) and amortized per-step overhead.
    B8 = _round_up(B, 8)
    if B8 <= 128:
        tb_eff = B8
        B_pad = B8
    else:
        half = _round_up((B8 + 1) // 2, 8)
        tb_eff = min(tb, half)
        B_pad = _round_up(B8, tb_eff)
    grid = (B_pad // tb_eff,)

    # Single-pass pad in the matmul dtype (no double materialization of x).
    x_p = jnp.pad(x.astype(mm_dtype), ((0, B_pad - B), (0, D_pad - D_in)))

    itemsize = jnp.dtype(mm_dtype).itemsize
    cost = pl.CostEstimate(
        flops=2 * B_pad * (D_pad * H + H * H + H * A_pad),
        transcendentals=0,
        bytes_accessed=(
            (x_p.size + w1_p.size + w2_p.size + w3_p.size) * itemsize
            + (b1_p.size + b2_p.size + b3_p.size) * 4
            + B_pad * A_pad * 4
        ),
    )

    out = pl.pallas_call(
        actor_kernel,
        out_shape=jax.ShapeDtypeStruct((B_pad, A_pad), jnp.float32),
        grid_spec=pltpu.PrefetchScalarGridSpec(
            num_scalar_prefetch=0,
            grid=grid,
            in_specs=[
                pl.BlockSpec((tb_eff, D_pad), lambda i: (i, 0)),  # x tile
                pl.BlockSpec((D_pad, H), lambda i: (0, 0)),       # W1 (resident)
                pl.BlockSpec((1, H), lambda i: (0, 0)),           # b1
                pl.BlockSpec((H, H), lambda i: (0, 0)),           # W2 (resident)
                pl.BlockSpec((1, H), lambda i: (0, 0)),           # b2
                pl.BlockSpec((H, A_pad), lambda i: (0, 0)),       # W3 (resident)
                pl.BlockSpec((1, A_pad), lambda i: (0, 0)),       # b3
            ],
            out_specs=pl.BlockSpec((tb_eff, A_pad), lambda i: (i, 0)),
        ),
        compiler_params=pltpu.CompilerParams(
            dimension_semantics=("parallel",),
        ),
        cost_estimate=cost,
    )(x_p, w1_p, b1_p, w2_p, b2_p, w3_p, b3_p)

    # Slice back to (B, num_actions).  Fused under the same jit, so this is not
    # an extra dispatch; downstream consumers could also read the padded buffer.
    return out[:B, :num_actions]


# ----------------------------------------------------------------------------
# Synthetic init (same shapes / layout as the nn.Linear layers, stored as
# (in_features, out_features) so the kernel computes x @ W + b).
# ----------------------------------------------------------------------------
def init_params(key, num_actions, d_in=50, hidden=256):
    k1, k2, k3, k4, k5, k6 = jax.random.split(key, 6)

    def uniform(k, shape, fan_in):
        bound = 1.0 / jnp.sqrt(jnp.float32(fan_in))
        return jax.random.uniform(k, shape, jnp.float32, -bound, bound)

    w1 = uniform(k1, (d_in, hidden), d_in)
    b1 = uniform(k2, (1, hidden), d_in)
    w2 = uniform(k3, (hidden, hidden), hidden)
    b2 = uniform(k4, (1, hidden), hidden)
    w3 = uniform(k5, (hidden, num_actions), hidden)
    b3 = uniform(k6, (1, num_actions), hidden)
    return (w1, b1, w2, b2, w3, b3)


def reference_forward(x, params):
    w1, b1, w2, b2, w3, b3 = params
    h1 = jnp.maximum(x @ w1 + b1, 0.0)
    h2 = jnp.maximum(h1 @ w2 + b2, 0.0)
    return h2 @ w3 + b3


if __name__ == "__main__":
    key = jax.random.PRNGKey(0)
    k_params, k_x, k_x2 = jax.random.split(key, 3)

    num_actions = 4
    params = init_params(k_params, num_actions)

    # Prepared (padded / cast) params: done once, reused every forward call.
    prepped_f32 = prepare_params(params, use_bf16=False)   # tight-tolerance path
    prepped_bf16 = prepare_params(params)                  # default fast path

    # Small-batch case: collapses to grid=(1,), single fused invocation.
    batch = 8
    x = jax.random.normal(k_x, (batch, 50), jnp.float32)
    ref = reference_forward(x, params)

    out = jax.block_until_ready(
        actor_net_forward(x, prepped_f32, num_actions=num_actions))
    assert out.shape == (batch, num_actions)
    assert jnp.allclose(out, ref, atol=1e-4, rtol=1e-4), "mismatch vs reference (f32, B=8)"

    out_bf16 = jax.block_until_ready(
        actor_net_forward(x, prepped_bf16, num_actions=num_actions))
    assert out_bf16.shape == (batch, num_actions)
    assert jnp.allclose(out_bf16, ref, atol=1e-1, rtol=1e-1), "mismatch vs reference (bf16, B=8)"

    # Multi-tile case: B=200 -> >= 2 grid steps (v7x megacore split exercised).
    batch2 = 200
    x2 = jax.random.normal(k_x2, (batch2, 50), jnp.float32)
    ref2 = reference_forward(x2, params)

    out2 = jax.block_until_ready(
        actor_net_forward(x2, prepped_f32, num_actions=num_actions))
    assert out2.shape == (batch2, num_actions)
    assert jnp.allclose(out2, ref2, atol=1e-4, rtol=1e-4), "mismatch vs reference (f32, B=200)"

    out2_bf16 = jax.block_until_ready(
        actor_net_forward(x2, prepped_bf16, num_actions=num_actions))
    assert jnp.allclose(out2_bf16, ref2, atol=1e-1, rtol=1e-1), "mismatch vs reference (bf16, B=200)"

    print("KERNEL_OK")
</pallas_src>

<mosaic_0001>
module attributes {stable_mosaic.version = 11 : i64} {
  func.func @actor_kernel(%arg0: i32, %arg1: memref<8x128xf32, #tpu.memory_space<vmem>>, %arg2: memref<128x256xf32, #tpu.memory_space<vmem>>, %arg3: memref<1x256xf32, #tpu.memory_space<vmem>>, %arg4: memref<256x256xf32, #tpu.memory_space<vmem>>, %arg5: memref<1x256xf32, #tpu.memory_space<vmem>>, %arg6: memref<256x128xf32, #tpu.memory_space<vmem>>, %arg7: memref<1x128xf32, #tpu.memory_space<vmem>>, %arg8: memref<8x128xf32, #tpu.memory_space<vmem>>) attributes {dimension_semantics = [#tpu.dimension_semantics<parallel>], iteration_bounds = array<i64: 1>, scalar_prefetch = 0 : i64, scratch_operands = 0 : i64, tpu.core_type = #tpu.core_type<tc>, window_params = [{transform_indices = @transform_0, window_bounds = array<i64: 8, 128>}, {pipeline_mode = #tpu.pipeline_mode<synchronous>, transform_indices = @transform_1, window_bounds = array<i64: 128, 256>}, {pipeline_mode = #tpu.pipeline_mode<synchronous>, transform_indices = @transform_2, window_bounds = array<i64: 1, 256>}, {pipeline_mode = #tpu.pipeline_mode<synchronous>, transform_indices = @transform_3, window_bounds = array<i64: 256, 256>}, {pipeline_mode = #tpu.pipeline_mode<synchronous>, transform_indices = @transform_4, window_bounds = array<i64: 1, 256>}, {pipeline_mode = #tpu.pipeline_mode<synchronous>, transform_indices = @transform_5, window_bounds = array<i64: 256, 128>}, {pipeline_mode = #tpu.pipeline_mode<synchronous>, transform_indices = @transform_6, window_bounds = array<i64: 1, 128>}, {transform_indices = @transform_7, window_bounds = array<i64: 8, 128>}]} {
    %c0 = arith.constant 0 : index
    %c0_0 = arith.constant 0 : index
    %0 = vector.load %arg1[%c0, %c0_0] : memref<8x128xf32, #tpu.memory_space<vmem>>, vector<8x128xf32>
    %c0_1 = arith.constant 0 : index
    %c0_2 = arith.constant 0 : index
    %1 = vector.load %arg2[%c0_1, %c0_2] : memref<128x256xf32, #tpu.memory_space<vmem>>, vector<128x256xf32>
    %cst = arith.constant dense<0.000000e+00> : vector<8x256xf32>
    %2 = tpu.matmul %0, %1, %cst {dimension_numbers = #tpu.dot_dimension_numbers<[1], [0], [0], [1], [0, 0, 1, 1], [], []>} : vector<8x128xf32>, vector<128x256xf32>, vector<8x256xf32> -> vector<8x256xf32>
    %c0_3 = arith.constant 0 : index
    %c0_4 = arith.constant 0 : index
    %3 = vector.load %arg3[%c0_3, %c0_4] : memref<1x256xf32, #tpu.memory_space<vmem>>, vector<1x256xf32>
    %4 = vector.broadcast %3 : vector<1x256xf32> to vector<8x256xf32>
    %5 = arith.addf %2, %4 : vector<8x256xf32>
    %cst_5 = arith.constant 0.000000e+00 : f32
    %6 = vector.broadcast %cst_5 : f32 to vector<8x256xf32>
    %7 = arith.maximumf %5, %6 : vector<8x256xf32>
    %c0_6 = arith.constant 0 : index
    %c0_7 = arith.constant 0 : index
    %8 = vector.load %arg4[%c0_6, %c0_7] : memref<256x256xf32, #tpu.memory_space<vmem>>, vector<256x256xf32>
    %cst_8 = arith.constant dense<0.000000e+00> : vector<8x256xf32>
    %9 = tpu.matmul %7, %8, %cst_8 {dimension_numbers = #tpu.dot_dimension_numbers<[1], [0], [0], [1], [0, 0, 1, 1], [], []>} : vector<8x256xf32>, vector<256x256xf32>, vector<8x256xf32> -> vector<8x256xf32>
    %c0_9 = arith.constant 0 : index
    %c0_10 = arith.constant 0 : index
    %10 = vector.load %arg5[%c0_9, %c0_10] : memref<1x256xf32, #tpu.memory_space<vmem>>, vector<1x256xf32>
    %11 = vector.broadcast %10 : vector<1x256xf32> to vector<8x256xf32>
    %12 = arith.addf %9, %11 : vector<8x256xf32>
    %cst_11 = arith.constant 0.000000e+00 : f32
    %13 = vector.broadcast %cst_11 : f32 to vector<8x256xf32>
    %14 = arith.maximumf %12, %13 : vector<8x256xf32>
    %c0_12 = arith.constant 0 : index
    %c0_13 = arith.constant 0 : index
    %15 = vector.load %arg6[%c0_12, %c0_13] : memref<256x128xf32, #tpu.memory_space<vmem>>, vector<256x128xf32>
    %cst_14 = arith.constant dense<0.000000e+00> : vector<8x128xf32>
    %16 = tpu.matmul %14, %15, %cst_14 {dimension_numbers = #tpu.dot_dimension_numbers<[1], [0], [0], [1], [0, 0, 1, 1], [], []>} : vector<8x256xf32>, vector<256x128xf32>, vector<8x128xf32> -> vector<8x128xf32>
    %c0_15 = arith.constant 0 : index
    %c0_16 = arith.constant 0 : index
    %17 = vector.load %arg7[%c0_15, %c0_16] : memref<1x128xf32, #tpu.memory_space<vmem>>, vector<1x128xf32>
    %18 = vector.broadcast %17 : vector<1x128xf32> to vector<8x128xf32>
    %19 = arith.addf %16, %18 : vector<8x128xf32>
    %c0_17 = arith.constant 0 : index
    %c0_18 = arith.constant 0 : index
    %20 = vector.load %arg8[%c0_17, %c0_18] : memref<8x128xf32, #tpu.memory_space<vmem>>, vector<8x128xf32>
    tpu.vector_store %arg8[%c0_17, %c0_18], %19 {strides = array<i32>} : memref<8x128xf32, #tpu.memory_space<vmem>>, vector<8x128xf32>,
    return
  }
  func.func @transform_0(%arg0: i32) -> (i32, i32) {
    %c0_i32 = arith.constant 0 : i32
    %c0_i32_0 = arith.constant 0 : i32
    return %arg0, %c0_i32 : i32, i32
  }
  func.func @transform_1(%arg0: i32) -> (i32, i32) {
    %c0_i32 = arith.constant 0 : i32
    %c0_i32_0 = arith.constant 0 : i32
    %c0_i32_1 = arith.constant 0 : i32
    return %c0_i32, %c0_i32_0 : i32, i32
  }
  func.func @transform_2(%arg0: i32) -> (i32, i32) {
    %c0_i32 = arith.constant 0 : i32
    %c0_i32_0 = arith.constant 0 : i32
    %c0_i32_1 = arith.constant 0 : i32
    return %c0_i32, %c0_i32_0 : i32, i32
  }
  func.func @transform_3(%arg0: i32) -> (i32, i32) {
    %c0_i32 = arith.constant 0 : i32
    %c0_i32_0 = arith.constant 0 : i32
    %c0_i32_1 = arith.constant 0 : i32
    return %c0_i32, %c0_i32_0 : i32, i32
  }
  func.func @transform_4(%arg0: i32) -> (i32, i32) {
    %c0_i32 = arith.constant 0 : i32
    %c0_i32_0 = arith.constant 0 : i32
    %c0_i32_1 = arith.constant 0 : i32
    return %c0_i32, %c0_i32_0 : i32, i32
  }
  func.func @transform_5(%arg0: i32) -> (i32, i32) {
    %c0_i32 = arith.constant 0 : i32
    %c0_i32_0 = arith.constant 0 : i32
    %c0_i32_1 = arith.constant 0 : i32
    return %c0_i32, %c0_i32_0 : i32, i32
  }
  func.func @transform_6(%arg0: i32) -> (i32, i32) {
    %c0_i32 = arith.constant 0 : i32
    %c0_i32_0 = arith.constant 0 : i32
    %c0_i32_1 = arith.constant 0 : i32
    return %c0_i32, %c0_i32_0 : i32, i32
  }
  func.func @transform_7(%arg0: i32) -> (i32, i32) {
    %c0_i32 = arith.constant 0 : i32
    %c0_i32_0 = arith.constant 0 : i32
    return %arg0, %c0_i32 : i32, i32
  }
}

</mosaic_0001>

<bundles_post_ra>
// kernel: actor_net_forward.1
= control target key start
LH: loop header
LB: loop body
LE: loop exit
PB: predicated region body
PF: predicated region fallthrough
CT: control target
= control target key end

     0   :  { %12 = vsyncpa [#allocation3], 0  ;;  %s798_s0 = inlined_call_operand.vmem [shape: f32[8,128], index: 0, kind: input, shape index: {}]   ;;  %s799_s1 = inlined_call_operand.hbm [shape: f32[128,256], index: 1, kind: input, shape index: {}]   ;;  %s800_s2 = inlined_call_operand.vmem [shape: f32[1,256], index: 2, kind: input, shape index: {}]   ;;  %s801_s3 = inlined_call_operand.hbm [shape: f32[256,256], index: 3, kind: input, shape index: {}]   ;;  %s802_s4 = inlined_call_operand.vmem [shape: f32[1,256], index: 4, kind: input, shape index: {}]   ;;  %s803_s5 = inlined_call_operand.hbm [shape: f32[256,128], index: 5, kind: input, shape index: {}]   ;;  %s804_s6 = inlined_call_operand.vmem [shape: f32[1,128], index: 6, kind: input, shape index: {}]   ;;  %s805_s7 = inlined_call_operand.vmem [shape: f32[8,128], index: 7, kind: output, shape index: {}]  }
   0x1   :  { %13 = vsyncpa [#allocation5], 0  ;;  %s692_s24 = smov [#allocation4]   ;;  %s693_s26 = smov [#allocation2]  }
   0x2   :  { %s35_s25 = sshll.u32 %s692_s24, 4  ;;  %s21_s27 = sshll.u32 %s693_s26, 4  ;;  %s36_s25 = int_to_ptr.vmem [resolvable:$true] %s35_s25  ;;  %s740_s27 = int_to_ptr.vmem [resolvable:$true] %s21_s27 }
   0x3   :  { %s622_s30 = scalar_lea.hbm %s801_s3, 8192 }
   0x4   :  { %p623_p0 = scmp.ne.s32.totalorder %s801_s3, %s622_s30  ;;  %p626_p1 = scmp.lt.u32.totalorder %s622_s30, %s801_s3 }
   0x6   :  { %p628_p2 = pnand %p626_p1, %p623_p0 }
   0x8   :  { %631 = shalt.err (!%p628_p2)
}
   0x9   :  { %s632_s12 = scalar_lea.vmem %s36_s25, 8192  ;;  %p637_p4 = scmp.lt.s32.totalorder %s36_s25, %s36_s25 }
   0xa   :  { %p633_p3 = scmp.ne.s32.totalorder %s36_s25, %s632_s12  ;;  %p638_p5 = scmp.lt.s32.totalorder %s632_s12, %s632_s12 }
   0xc   :  { %p639_p6 = por %p638_p5, %p637_p4 }
   0xe   :  { %p640_p7 = pnand %p639_p6, %p633_p3 }
  0x10   :  { %643 = shalt.err (!%p640_p7)
}
  0x11   :  { %s694_s13 = smov 256   ;;  %s695_s14 = smov 16  }
  0x12   :  { %41 = dma.hbm_to_vmem [thread:$0]  %s801_s3, 8192, %s36_s25, [#allocation5], %s694_s13, %s694_s13, %s695_s14  }
  0x13   :  { %s644_s19 = scalar_lea.hbm %s799_s1, 4096 }
  0x14   :  { %p645_p8 = scmp.ne.s32.totalorder %s799_s1, %s644_s19  ;;  %p648_p9 = scmp.lt.u32.totalorder %s644_s19, %s799_s1 }
  0x16   :  { %p650_p10 = pnand %p648_p9, %p645_p8 }
  0x18   :  { %653 = shalt.err (!%p650_p10)
}
  0x19   :  { %s654_s24 = scalar_lea.vmem %s740_s27, 4096  ;;  %p659_p12 = scmp.lt.s32.totalorder %s740_s27, %s740_s27 }
  0x1a   :  { %p655_p11 = scmp.ne.s32.totalorder %s740_s27, %s654_s24  ;;  %p660_p13 = scmp.lt.s32.totalorder %s654_s24, %s654_s24 }
  0x1c   :  { %p661_p0 = por %p660_p13, %p659_p12 }
  0x1e   :  { %p662_p1 = pnand %p661_p0, %p655_p11 }
  0x20   :  { %665 = shalt.err (!%p662_p1)
}
  0x21   :  { %27 = dma.hbm_to_vmem [thread:$0]  %s799_s1, 4096, %s740_s27, [#allocation3], %s694_s13, %s694_s13, %s695_s14  }
  0x22   :  { %s696_s26 = smov [#allocation6]   ;;  %s666_s8 = scalar_lea.hbm %s803_s5, 4096 }
  0x23   :  { %s49_s28 = sshll.u32 %s696_s26, 4  ;;  %p667_p2 = scmp.ne.s32.totalorder %s803_s5, %s666_s8  ;;  %s50_s28 = int_to_ptr.vmem [resolvable:$true] %s49_s28 }
  0x24   :  { %p670_p3 = scmp.lt.u32.totalorder %s666_s8, %s803_s5 }
  0x26   :  { %p672_p4 = pnand %p670_p3, %p667_p2 }
  0x28   :  { %675 = shalt.err (!%p672_p4)
}
  0x29   :  { %s676_s15 = scalar_lea.vmem %s50_s28, 4096  ;;  %p681_p6 = scmp.lt.s32.totalorder %s50_s28, %s50_s28 }
  0x2a   :  { %p677_p5 = scmp.ne.s32.totalorder %s50_s28, %s676_s15  ;;  %p682_p7 = scmp.lt.s32.totalorder %s676_s15, %s676_s15 }
  0x2c   :  { %p683_p8 = por %p682_p7, %p681_p6 }
  0x2e   :  { %p684_p9 = pnand %p683_p8, %p677_p5 }
  0x30   :  { %687 = shalt.err (!%p684_p9)
}
  0x31   :  { %s697_s1 = smov 128   ;;  %s698_s27 = smov 8  }
  0x32   :  { %55 = dma.hbm_to_vmem [thread:$0]  %s803_s5, 4096, %s50_s28, [#allocation5], %s697_s1, %s697_s1, %s698_s27  }
  0x33   :  { %688 = dma.done.wait [#allocation3], 4096  }
  0x34   :  { %689 = vsyncadd [#allocation3], 4294963200 }
  0x35   :  { %690 = dma.done.wait [#allocation5], 12288  }
  0x36   :  { %691 = vsyncadd [#allocation5], 4294955008  ;;  %v699_v0 = vmov 0.0   ;;  %v69_v1 = vld [vmem:[#allocation2 + $0x8] sm:$0xff]  ;;  %v71_v2 = vld [vmem:[#allocation2 + $0x18] sm:$0xff] }
  0x37   :  { %176 = vmatprep.mubr.f32.mxu0 %v699_v0  ;;  %v68_v3 = vld [vmem:[#allocation2] sm:$0xff]  ;;  %v486_v4 = vpack.c.bf16 %v71_v2, %v69_v1  ;;  %v70_v5 = vld [vmem:[#allocation2 + $0x10] sm:$0xff]  ;;  %v73_v6 = vld [vmem:[#allocation2 + $0x28] sm:$0xff] }
  0x38   :  { %v75_v7 = vld [vmem:[#allocation2 + $0x38] sm:$0xff]  ;;  %v488_v8 = vpack.c.bf16 %v70_v5, %v68_v3  ;;  %v72_v10 = vld [vmem:[#allocation2 + $0x20] sm:$0xff]  ;;  %v74_v11 = vld [vmem:[#allocation2 + $0x30] sm:$0xff] }
  0x39   :  { %v490_v9 = vpack.c.bf16 %v75_v7, %v73_v6  ;;  %v77_v12 = vld [vmem:[#allocation2 + $0x48] sm:$0xff]  ;;  %487 = vmatprep.subr.bf16.mxu0 %v486_v4  ;;  %v79_v13 = vld [vmem:[#allocation2 + $0x58] sm:$0xff]  ;;  %v492_v14 = vpack.c.bf16 %v74_v11, %v72_v10  ;;  %v76_v16 = vld [vmem:[#allocation2 + $0x40] sm:$0xff] }
  0x3a   :  { %489 = vmatpush1.bf16.msra.mxu0 %v488_v8  ;;  %v494_v15 = vpack.c.bf16 %v79_v13, %v77_v12  ;;  %v78_v17 = vld [vmem:[#allocation2 + $0x50] sm:$0xff]  ;;  %v81_v18 = vld [vmem:[#allocation2 + $0x68] sm:$0xff]  ;;  %v83_v19 = vld [vmem:[#allocation2 + $0x78] sm:$0xff] }
  0x3b   :  { %491 = vmatprep.subr.bf16.mxu0 %v490_v9  ;;  %v496_v20 = vpack.c.bf16 %v78_v17, %v76_v16  ;;  %v498_v21 = vpack.c.bf16 %v83_v19, %v81_v18  ;;  %v80_v22 = vld [vmem:[#allocation2 + $0x60] sm:$0xff]  ;;  %v82_v23 = vld [vmem:[#allocation2 + $0x70] sm:$0xff]  ;;  %v85_v24 = vld [vmem:[#allocation2 + $0x88] sm:$0xff] }
  0x3c   :  { %v87_v25 = vld [vmem:[#allocation2 + $0x98] sm:$0xff]  ;;  %v84_v26 = vld [vmem:[#allocation2 + $0x80] sm:$0xff]  ;;  %v86_v27 = vld [vmem:[#allocation2 + $0x90] sm:$0xff]  ;;  %v500_v31 = vpack.c.bf16 %v82_v23, %v80_v22 }
  0x3d   :  { %v186_v28 = vld [vmem:[#allocation4 + $0x8] sm:$0xff]  ;;  %v188_v29 = vld [vmem:[#allocation4 + $0x18] sm:$0xff]  ;;  %v185_v30 = vld [vmem:[#allocation4] sm:$0xff]  ;;  %v502_v36 = vpack.c.bf16 %v87_v25, %v85_v24  ;;  %v504_v46 = vpack.c.bf16 %v86_v27, %v84_v26 }
  0x3e   :  { %493 = vmatpush1.bf16.msra.mxu0 %v492_v14  ;;  %v518_v32 = vpack.c.bf16 %v188_v29, %v186_v28  ;;  %v187_v33 = vld [vmem:[#allocation4 + $0x10] sm:$0xff]  ;;  %v190_v34 = vld [vmem:[#allocation4 + $0x28] sm:$0xff]  ;;  %v192_v35 = vld [vmem:[#allocation4 + $0x38] sm:$0xff] }
  0x3f   :  { %495 = vmatprep.subr.bf16.mxu0 %v494_v15  ;;  %v520_v37 = vpack.c.bf16 %v187_v33, %v185_v30  ;;  %v522_v38 = vpack.c.bf16 %v192_v35, %v190_v34  ;;  %v189_v39 = vld [vmem:[#allocation4 + $0x20] sm:$0xff]  ;;  %v191_v40 = vld [vmem:[#allocation4 + $0x30] sm:$0xff]  ;;  %v194_v41 = vld [vmem:[#allocation4 + $0x48] sm:$0xff] }
  0x40   :  { %v89_v42 = vld [vmem:[#allocation2 + $0xa8] sm:$0xff]  ;;  %v91_v43 = vld [vmem:[#allocation2 + $0xb8] sm:$0xff]  ;;  %519 = vmatprep.subr.bf16.mxu1 %v518_v32  ;;  %v524_v45 = vpack.c.bf16 %v191_v40, %v189_v39  ;;  %v88_v47 = vld [vmem:[#allocation2 + $0xa0] sm:$0xff] }
  0x41   :  { %v196_v44 = vld [vmem:[#allocation4 + $0x58] sm:$0xff]  ;;  %521 = vmatpush1.bf16.msra.mxu1 %v520_v37  ;;  %v193_v49 = vld [vmem:[#allocation4 + $0x40] sm:$0xff]  ;;  %v195_v50 = vld [vmem:[#allocation4 + $0x50] sm:$0xff]  ;;  %v506_v51 = vpack.c.bf16 %v91_v43, %v89_v42 }
  0x42   :  { %497 = vmatpush1.bf16.msra.mxu0 %v496_v20  ;;  %523 = vmatprep.subr.bf16.mxu1 %v522_v38  ;;  %v526_v48 = vpack.c.bf16 %v196_v44, %v194_v41  ;;  %v90_v52 = vld [vmem:[#allocation2 + $0xb0] sm:$0xff]  ;;  %v198_v53 = vld [vmem:[#allocation4 + $0x68] sm:$0xff]  ;;  %v200_v54 = vld [vmem:[#allocation4 + $0x78] sm:$0xff]  ;;  %v528_v57 = vpack.c.bf16 %v195_v50, %v193_v49 }
  0x43   :  { %499 = vmatprep.subr.bf16.mxu0 %v498_v21  ;;  %v93_v55 = vld [vmem:[#allocation2 + $0xc8] sm:$0xff]  ;;  %v95_v56 = vld [vmem:[#allocation2 + $0xd8] sm:$0xff]  ;;  %v508_v58 = vpack.c.bf16 %v90_v52, %v88_v47  ;;  %v92_v59 = vld [vmem:[#allocation2 + $0xc0] sm:$0xff]  ;;  %v530_v60 = vpack.c.bf16 %v200_v54, %v198_v53 }
  0x44   :  { %v197_v61 = vld [vmem:[#allocation4 + $0x60] sm:$0xff]  ;;  %v199_v62 = vld [vmem:[#allocation4 + $0x70] sm:$0xff]  ;;  %v510_v63 = vpack.c.bf16 %v95_v56, %v93_v55  ;;  %v202_v1 = vld [vmem:[#allocation4 + $0x88] sm:$0xff] }
  0x45   :  { %525 = vmatpush1.bf16.msra.mxu1 %v524_v45  ;;  %v94_v0 = vld [vmem:[#allocation2 + $0xd0] sm:$0xff]  ;;  %v204_v2 = vld [vmem:[#allocation4 + $0x98] sm:$0xff]  ;;  %v97_v3 = vld [vmem:[#allocation2 + $0xe8] sm:$0xff]  ;;  %v532_v5 = vpack.c.bf16 %v199_v62, %v197_v61 }
  0x46   :  { %501 = vmatpush1.bf16.msra.mxu0 %v500_v31  ;;  %527 = vmatprep.subr.bf16.mxu1 %v526_v48  ;;  %v99_v4 = vld [vmem:[#allocation2 + $0xf8] sm:$0xff]  ;;  %v512_v6 = vpack.c.bf16 %v94_v0, %v92_v59  ;;  %v96_v7 = vld [vmem:[#allocation2 + $0xe0] sm:$0xff]  ;;  %v534_v8 = vpack.c.bf16 %v204_v2, %v202_v1  ;;  %v203_v10 = vld [vmem:[#allocation4 + $0x90] sm:$0xff] }
  0x47   :  { %503 = vmatprep.subr.bf16.mxu0 %v502_v36  ;;  %v201_v9 = vld [vmem:[#allocation4 + $0x80] sm:$0xff]  ;;  %v514_v11 = vpack.c.bf16 %v99_v4, %v97_v3  ;;  %v98_v12 = vld [vmem:[#allocation2 + $0xf0] sm:$0xff]  ;;  %v206_v13 = vld [vmem:[#allocation4 + $0xa8] sm:$0xff] }
  0x48   :  { %v208_v14 = vld [vmem:[#allocation4 + $0xb8] sm:$0xff]  ;;  %v536_v15 = vpack.c.bf16 %v203_v10, %v201_v9  ;;  %v516_v16 = vpack.c.bf16 %v98_v12, %v96_v7  ;;  %v205_v18 = vld [vmem:[#allocation4 + $0xa0] sm:$0xff]  ;;  %v207_v19 = vld [vmem:[#allocation4 + $0xb0] sm:$0xff] }
  0x49   :  { %529 = vmatpush1.bf16.msra.mxu1 %v528_v57  ;;  %v538_v17 = vpack.c.bf16 %v208_v14, %v206_v13  ;;  %v210_v20 = vld [vmem:[#allocation4 + $0xc8] sm:$0xff]  ;;  %v212_v21 = vld [vmem:[#allocation4 + $0xd8] sm:$0xff]  ;;  %v540_v22 = vpack.c.bf16 %v207_v19, %v205_v18  ;;  %v67_v23 = vld [vmem:[%s798_s0] sm:$0xff] }
  0x4a   :  { %505 = vmatpush1.bf16.msra.mxu0 %v504_v46  ;;  %531 = vmatprep.subr.bf16.mxu1 %v530_v60  ;;  %v542_v24 = vpack.c.bf16 %v212_v21, %v210_v20  ;;  %v209_v25 = vld [vmem:[#allocation4 + $0xc0] sm:$0xff]  ;;  %v211_v26 = vld [vmem:[#allocation4 + $0xd0] sm:$0xff]  ;;  %v214_v27 = vld [vmem:[#allocation4 + $0xe8] sm:$0xff] }
  0x4b   :  { %507 = vmatprep.subr.bf16.mxu0 %v506_v51  ;;  %v216_v28 = vld [vmem:[#allocation4 + $0xf8] sm:$0xff]  ;;  %v544_v29 = vpack.c.bf16 %v211_v26, %v209_v25  ;;  %v213_v31 = vld [vmem:[#allocation4 + $0xe0] sm:$0xff]  ;;  %v215_v32 = vld [vmem:[#allocation4 + $0xf0] sm:$0xff] }
  0x4c   :  { %v546_v30 = vpack.c.bf16 %v216_v28, %v214_v27  ;;  %v218_v33 = vld [vmem:[#allocation4 + $0x108] sm:$0xff]  ;;  %v220_v34 = vld [vmem:[#allocation4 + $0x118] sm:$0xff]  ;;  %v548_v35 = vpack.c.bf16 %v215_v32, %v213_v31  ;;  %v217_v37 = vld [vmem:[#allocation4 + $0x100] sm:$0xff] }
  0x4d   :  { %533 = vmatpush1.bf16.msra.mxu1 %v532_v5  ;;  %v550_v36 = vpack.c.bf16 %v220_v34, %v218_v33  ;;  %v219_v38 = vld [vmem:[#allocation4 + $0x110] sm:$0xff]  ;;  %v222_v39 = vld [vmem:[#allocation4 + $0x128] sm:$0xff]  ;;  %v224_v40 = vld [vmem:[#allocation4 + $0x138] sm:$0xff] }
  0x4e   :  { %509 = vmatpush1.bf16.msra.mxu0 %v508_v58  ;;  %535 = vmatprep.subr.bf16.mxu1 %v534_v8  ;;  %v552_v41 = vpack.c.bf16 %v219_v38, %v217_v37  ;;  %v554_v42 = vpack.c.bf16 %v224_v40, %v222_v39  ;;  %v221_v43 = vld [vmem:[#allocation4 + $0x120] sm:$0xff]  ;;  %v223_v44 = vld [vmem:[#allocation4 + $0x130] sm:$0xff]  ;;  %v226_v45 = vld [vmem:[#allocation4 + $0x148] sm:$0xff] }
  0x4f   :  { %511 = vmatprep.subr.bf16.mxu0 %v510_v63  ;;  %v228_v46 = vld [vmem:[#allocation4 + $0x158] sm:$0xff]  ;;  %v556_v47 = vpack.c.bf16 %v223_v44, %v221_v43  ;;  %v225_v49 = vld [vmem:[#allocation4 + $0x140] sm:$0xff]  ;;  %v227_v50 = vld [vmem:[#allocation4 + $0x150] sm:$0xff] }
  0x50   :  { %v558_v48 = vpack.c.bf16 %v228_v46, %v226_v45  ;;  %v230_v51 = vld [vmem:[#allocation4 + $0x168] sm:$0xff]  ;;  %v232_v52 = vld [vmem:[#allocation4 + $0x178] sm:$0xff]  ;;  %v560_v53 = vpack.c.bf16 %v227_v50, %v225_v49  ;;  %v229_v55 = vld [vmem:[#allocation4 + $0x160] sm:$0xff] }
  0x51   :  { %537 = vmatpush1.bf16.msra.mxu1 %v536_v15  ;;  %v562_v54 = vpack.c.bf16 %v232_v52, %v230_v51  ;;  %v231_v56 = vld [vmem:[#allocation4 + $0x170] sm:$0xff]  ;;  %v234_v57 = vld [vmem:[#allocation4 + $0x188] sm:$0xff]  ;;  %v236_v58 = vld [vmem:[#allocation4 + $0x198] sm:$0xff] }
  0x52   :  { %513 = vmatpush1.bf16.msra.mxu0 %v512_v6  ;;  %539 = vmatprep.subr.bf16.mxu1 %v538_v17  ;;  %v564_v59 = vpack.c.bf16 %v231_v56, %v229_v55  ;;  %v566_v60 = vpack.c.bf16 %v236_v58, %v234_v57  ;;  %v233_v61 = vld [vmem:[#allocation4 + $0x180] sm:$0xff]  ;;  %v235_v62 = vld [vmem:[#allocation4 + $0x190] sm:$0xff]  ;;  %v238_v63 = vld [vmem:[#allocation4 + $0x1a8] sm:$0xff]  ;;  %v102_v57 = vlaneseq }
  0x53   :  { %515 = vmatprep.subr.bf16.mxu0 %v514_v11  ;;  %v240_v0 = vld [vmem:[#allocation4 + $0x1b8] sm:$0xff]  ;;  %v568_v1 = vpack.c.bf16 %v235_v62, %v233_v61  ;;  %v237_v3 = vld [vmem:[#allocation4 + $0x1a0] sm:$0xff]  ;;  %v239_v4 = vld [vmem:[#allocation4 + $0x1b0] sm:$0xff] }
  0x54   :  { %v570_v2 = vpack.c.bf16 %v240_v0, %v238_v63  ;;  %v242_v5 = vld [vmem:[#allocation4 + $0x1c8] sm:$0xff]  ;;  %v244_v6 = vld [vmem:[#allocation4 + $0x1d8] sm:$0xff]  ;;  %v572_v7 = vpack.c.bf16 %v239_v4, %v237_v3  ;;  %v241_v9 = vld [vmem:[#allocation4 + $0x1c0] sm:$0xff]  ;;  %v103_v58 = vshrl.u32 %v102_v57, 7 }
  0x55   :  { %541 = vmatpush1.bf16.msra.mxu1 %v540_v22  ;;  %v574_v8 = vpack.c.bf16 %v244_v6, %v242_v5  ;;  %v243_v10 = vld [vmem:[#allocation4 + $0x1d0] sm:$0xff]  ;;  %v246_v12 = vld [vmem:[#allocation4 + $0x1e8] sm:$0xff]  ;;  %v248_v13 = vld [vmem:[#allocation4 + $0x1f8] sm:$0xff] }
  0x56   :  { %517 = vmatpush1.bf16.msra.mxu0 %v516_v16  ;;  %543 = vmatprep.subr.bf16.mxu1 %v542_v24  ;;  %v576_v11 = vpack.c.bf16 %v243_v10, %v241_v9  ;;  %v578_v14 = vpack.c.bf16 %v248_v13, %v246_v12  ;;  %v245_v15 = vld [vmem:[#allocation4 + $0x1e0] sm:$0xff]  ;;  %v247_v16 = vld [vmem:[#allocation4 + $0x1f0] sm:$0xff]  ;;  %v351_v19 = vld [vmem:[#allocation6 + $0x88] sm:$0xff]  ;;  %v108_v61 = vsub.s32 1, %v103_v58 }
  0x57   :  { %v580_v17 = vpack.c.bf16 %v247_v16, %v245_v15  ;;  %v350_v18 = vld [vmem:[#allocation6 + $0x80] sm:$0xff]  ;;  %v335_v22 = vld [vmem:[#allocation6 + $0x8] sm:$0xff]  ;;  %v353_v24 = vld [vmem:[#allocation6 + $0x98] sm:$0xff] }
  0x58   :  { %v334_v20 = vld [vmem:[#allocation6] sm:$0xff]  ;;  %v582_v21 = vpack.c.bf16 %v351_v19, %v350_v18  ;;  %v336_v27 = vld [vmem:[#allocation6 + $0x10] sm:$0xff]  ;;  %v337_v28 = vld [vmem:[#allocation6 + $0x18] sm:$0xff] }
  0x59   :  { %177 = vmatmul.mubr.f32.vlgmr.msra.gmra.mrb[0].mxu0 %v67_v23  ;;  %545 = vmatpush1.bf16.msra.mxu1 %v544_v29  ;;  %v352_v23 = vld [vmem:[#allocation6 + $0x90] sm:$0xff]  ;;  %v584_v25 = vpack.c.bf16 %v335_v22, %v334_v20  ;;  %v354_v29 = vld [vmem:[#allocation6 + $0xa0] sm:$0xff]  ;;  %v588_v31 = vpack.c.bf16 %v337_v28, %v336_v27  ;;  %v339_v34 = vld [vmem:[#allocation6 + $0x28] sm:$0xff] }
  0x5a   :  { %547 = vmatprep.subr.bf16.mxu1 %v546_v30  ;;  %v586_v26 = vpack.c.bf16 %v353_v24, %v352_v23  ;;  %583 = vmatprep.subr.bf16.mxu0 %v582_v21  ;;  %v355_v30 = vld [vmem:[#allocation6 + $0xa8] sm:$0xff]  ;;  %v338_v33 = vld [vmem:[#allocation6 + $0x20] sm:$0xff]  ;;  %v340_v39 = vld [vmem:[#allocation6 + $0x30] sm:$0xff] }
  0x5b   :  { %585 = vmatpush3.bf16.msra.mxu0 %v584_v25  ;;  %v590_v32 = vpack.c.bf16 %v355_v30, %v354_v29  ;;  %v592_v37 = vpack.c.bf16 %v339_v34, %v338_v33  ;;  %v341_v40 = vld [vmem:[#allocation6 + $0x38] sm:$0xff]  ;;  %v342_v45 = vld [vmem:[#allocation6 + $0x40] sm:$0xff]  ;;  %v343_v46 = vld [vmem:[#allocation6 + $0x48] sm:$0xff] }
  0x5c   :  { %587 = vmatprep.subr.bf16.mxu0 %v586_v26  ;;  %v596_v43 = vpack.c.bf16 %v341_v40, %v340_v39  ;;  %v600_v49 = vpack.c.bf16 %v343_v46, %v342_v45  ;;  %v344_v51 = vld [vmem:[#allocation6 + $0x50] sm:$0xff]  ;;  %v345_v52 = vld [vmem:[#allocation6 + $0x58] sm:$0xff]  ;;  %v346_v6 = vld [vmem:[#allocation6 + $0x60] sm:$0xff] }
  0x5d   :  { %549 = vmatpush1.bf16.msra.mxu1 %v548_v35  ;;  %v356_v35 = vld [vmem:[#allocation6 + $0xb0] sm:$0xff]  ;;  %v604_v55 = vpack.c.bf16 %v345_v52, %v344_v51  ;;  %v365_v10 = vld [vmem:[#allocation6 + $0xf8] sm:$0xff]  ;;  %v249_v15 = vld [vmem:[%s802_s4] sm:$0x3] }
  0x5e   :  { %551 = vmatprep.subr.bf16.mxu1 %v550_v36  ;;  %v357_v36 = vld [vmem:[#allocation6 + $0xb8] sm:$0xff]  ;;  %v364_v9 = vld [vmem:[#allocation6 + $0xf0] sm:$0xff]  ;;  %v450_v25 = vld [vmem:[%s804_s6] ss:$0 sm:$0xff] }
  0x5f   :  { %589 = vmatpush3.bf16.msra.mxu0 %v588_v31  ;;  %v594_v38 = vpack.c.bf16 %v357_v36, %v356_v35  ;;  %v348_v12 = vld [vmem:[#allocation6 + $0x70] sm:$0xff]  ;;  %v349_v13 = vld [vmem:[#allocation6 + $0x78] sm:$0xff] }
  0x60   :  { %591 = vmatprep.subr.bf16.mxu0 %v590_v32 }
  0x61   :  { %553 = vmatpush1.bf16.msra.mxu1 %v552_v41  ;;  %v358_v41 = vld [vmem:[#allocation6 + $0xc0] sm:$0xff] }
  0x62   :  { %555 = vmatprep.subr.bf16.mxu1 %v554_v42  ;;  %v359_v42 = vld [vmem:[#allocation6 + $0xc8] sm:$0xff] }
  0x63   :  { %593 = vmatpush3.bf16.msra.mxu0 %v592_v37  ;;  %v598_v44 = vpack.c.bf16 %v359_v42, %v358_v41 }
  0x64   :  { %595 = vmatprep.subr.bf16.mxu0 %v594_v38 }
  0x65   :  { %557 = vmatpush1.bf16.msra.mxu1 %v556_v47  ;;  %v360_v47 = vld [vmem:[#allocation6 + $0xd0] sm:$0xff] }
  0x66   :  { %559 = vmatprep.subr.bf16.mxu1 %v558_v48  ;;  %v361_v48 = vld [vmem:[#allocation6 + $0xd8] sm:$0xff] }
  0x67   :  { %597 = vmatpush3.bf16.msra.mxu0 %v596_v43  ;;  %v602_v50 = vpack.c.bf16 %v361_v48, %v360_v47 }
  0x68   :  { %599 = vmatprep.subr.bf16.mxu0 %v598_v44 }
  0x69   :  { %561 = vmatpush1.bf16.msra.mxu1 %v560_v53  ;;  %v362_v53 = vld [vmem:[#allocation6 + $0xe0] sm:$0xff] }
  0x6a   :  { %563 = vmatprep.subr.bf16.mxu1 %v562_v54  ;;  %v363_v54 = vld [vmem:[#allocation6 + $0xe8] sm:$0xff] }
  0x6b   :  { %601 = vmatpush3.bf16.msra.mxu0 %v600_v49  ;;  %v606_v56 = vpack.c.bf16 %v363_v54, %v362_v53 }
  0x6c   :  { %603 = vmatprep.subr.bf16.mxu0 %v602_v50 }
  0x6d   :  { %565 = vmatpush1.bf16.msra.mxu1 %v564_v59  ;;  %v104_v59 = vsub.s32 0, %v103_v58 }
  0x6e   :  { %567 = vmatprep.subr.bf16.mxu1 %v566_v60  ;;  %v100_v60 = vld [vmem:[%s800_s2] sm:$0x3] }
  0x6f   :  { %605 = vmatpush3.bf16.msra.mxu0 %v604_v55  ;;  %v105_v62 = vrot.slane %v100_v60, %v104_v59  ;;  %v109_v63 = vrot.slane %v100_v60, %v108_v61  ;;  %v254_v16 = vrot.slane %v249_v15, %v104_v59 }
  0x70   :  { %607 = vmatprep.subr.bf16.mxu0 %v606_v56 }
  0x71   :  { %569 = vmatpush1.bf16.msra.mxu1 %v568_v1 }
  0x72   :  { %571 = vmatprep.subr.bf16.mxu1 %v570_v2 }
  0x75   :  { %573 = vmatpush1.bf16.msra.mxu1 %v572_v7  ;;  %v347_v7 = vld [vmem:[#allocation6 + $0x68] sm:$0xff] }
  0x76   :  { %575 = vmatprep.subr.bf16.mxu1 %v574_v8  ;;  %v608_v8 = vpack.c.bf16 %v347_v7, %v346_v6 }
  0x78   :  { %609 = vmatpush3.bf16.msra.mxu0 %v608_v8 }
  0x79   :  { %577 = vmatpush1.bf16.msra.mxu1 %v576_v11  ;;  %v610_v11 = vpack.c.bf16 %v365_v10, %v364_v9 }
  0x7a   :  { %579 = vmatprep.subr.bf16.mxu1 %v578_v14  ;;  %v612_v14 = vpack.c.bf16 %v349_v13, %v348_v12 }
  0x7b   :  { %611 = vmatprep.subr.bf16.mxu0 %v610_v11 }
  0x7c   :  { %613 = vmatpush3.bf16.msra.mxu0 %v612_v14 }
  0x7d   :  { %581 = vmatpush1.bf16.msra.mxu1 %v580_v17  ;;  %v258_v17 = vrot.slane %v249_v15, %v108_v61 }
 0x12c   :  { %v178_v0 = vpop.f32.mrb[0].mxu0 }
 0x12d   :  { %v179_v1 = vadd.f32 %v178_v0, %v105_v62  ;;  %v180_v2 = vpop.f32.mrb[1].mxu0 }
 0x12e   :  { %v181_v3 = vadd.f32 %v180_v2, %v109_v63 }
 0x12f   :  { %v183_v5 = vmax.f32 %v179_v1, 0.0 }
 0x130   :  { %v184_v4 = vmax.f32 %v181_v3, 0.0 }
 0x132   :  { %325 = vmatprep.mubr.f32.mxu1 %v184_v4 }
 0x133   :  { %326 = vmatmul.mubr.f32.vlgmr.msra.gmra.mrb[0].mxu1 %v183_v5 }
 0x206   :  { %v327_v18 = vpop.f32.mrb[0].mxu1 }
 0x207   :  { %v328_v19 = vadd.f32 %v327_v18, %v254_v16  ;;  %v329_v20 = vpop.f32.mrb[1].mxu1 }
 0x208   :  { %v330_v21 = vadd.f32 %v329_v20, %v258_v17 }
 0x209   :  { %v332_v23 = vmax.f32 %v328_v19, 0.0 }
 0x20a   :  { %v333_v22 = vmax.f32 %v330_v21, 0.0 }
 0x20c   :  { %437 = vmatprep.mubr.f32.mxu0 %v333_v22 }
 0x20d   :  { %438 = vmatmul.mubr.f32.vlgmr.msra.gmra.mrb[2].mxu0 %v332_v23 }
 0x2e0   :  { %v483_v24 = vpop.f32.mrb[2].mxu0 }
 0x2e1   :  { %v484_v26 = vpop.f32.mrb[3].mxu0 }
 0x2e2   :  { %v485_v27 = vadd.f32 %v484_v26, %v483_v24 }
 0x2e4   :  { %v440_v28 = vadd.f32 %v485_v27, %v450_v25 }
 0x2e6   :  { %443 = vst [vmem:[%s805_s7] sm:$0xff] %v440_v28 }
 0x2e7   :  { %448 = vsyncpa [#allocation3], 1 }
 0x2e8   :  { %449 = vsyncpa [#allocation5], 1 }

</bundles_post_ra>
